<compile_context>
chip_gen: v7x
topology: tpu7x:2x2x1
jax: 0.10.0
libtpu: 0.0.40
codegen_flags: <defaults>
</compile_context>

<pallas_src>
import functools

import jax
import jax.numpy as jnp
from jax.experimental import pallas as pl
from jax.experimental.pallas import tpu as pltpu


def _round_up(x, m):
    return (x + m - 1) // m * m


def _cdiv(a, b):
    return -(-a // b)


# ---------------------------------------------------------------------------
# Kernels
# ---------------------------------------------------------------------------
def _fused_bias_kernel(x_ref, wt_ref, b_ref, o_ref):
    """One output tile with the full K resident in VMEM: single MXU dot with
    the bias fused into the store.  No accumulator RMW, no init/finalize."""
    o_ref[...] = (
        jnp.dot(x_ref[...], wt_ref[...], preferred_element_type=jnp.float32)
        + b_ref[...]
    ).astype(o_ref.dtype)


def _acc_bias_kernel(x_ref, wt_ref, b_ref, o_ref, acc_ref):
    """K-tiled variant: f32 VMEM accumulator over the (arbitrary) K grid axis,
    bias added exactly once in the finalize step."""
    k = pl.program_id(2)

    @pl.when(k == 0)
    def _init():
        acc_ref[...] = jnp.zeros_like(acc_ref)

    acc_ref[...] += jnp.dot(
        x_ref[...], wt_ref[...], preferred_element_type=jnp.float32
    )

    @pl.when(k == pl.num_programs(2) - 1)
    def _finalize():
        o_ref[...] = (acc_ref[...] + b_ref[...]).astype(o_ref.dtype)


# ---------------------------------------------------------------------------
# One-time parameter layout prep (module "init")
# ---------------------------------------------------------------------------
def prepare_dec_linear_params(weight, bias, *, compute_dtype=jnp.bfloat16):
    """PyTorch nn.Linear weight (O, F) -> transposed, padded, lane-dense (Fp, Op)
    weight in `compute_dtype` (default bf16); bias -> padded (1, Op) f32.
    The true out_dim/in_dim are carried alongside so the forward never returns
    silently-zero padded columns.  Done once, so the forward never pays a
    per-call HBM transpose/pad of the weight."""
    O, F = weight.shape
    assert bias.shape == (O,)
    Fp = _round_up(F, 128)
    Op = _round_up(O, 128)
    cdt = jnp.dtype(compute_dtype)
    wt = jnp.zeros((Fp, Op), cdt).at[:F, :O].set(weight.T.astype(cdt))
    b2 = jnp.zeros((1, Op), jnp.float32).at[0, :O].set(bias.astype(jnp.float32))
    return {"weight_t": wt, "bias": b2, "in_dim": F, "out_dim": O}


# ---------------------------------------------------------------------------
# Forward
# ---------------------------------------------------------------------------
@functools.partial(jax.jit, static_argnames=("out_dim", "tm", "tn", "tk_max"))
def _dec_linear_fwd(x, wt, b, *, out_dim, tm, tn, tk_max):
    B, F = x.shape
    Fp, Op = wt.shape
    cdt = wt.dtype
    out_dtype = x.dtype
    cbytes = jnp.dtype(cdt).itemsize
    obytes = jnp.dtype(out_dtype).itemsize

    # ------------------ small-shape fast path ------------------------------
    # Whole problem fits comfortably in VMEM as one block (full-array block
    # shapes bypass the (8,128) rule): one dispatch, no grid, no batch pad,
    # no per-step pipeline overhead.  This is the path the module's real
    # shapes (B=8, F=32, O=64) take.
    whole_bytes = (B * Fp + Fp * Op) * cbytes + Op * 4 + B * Op * obytes
    if whole_bytes <= (2 << 20):
        xc = x.astype(cdt)
        if Fp != F:
            xc = jnp.pad(xc, ((0, 0), (0, Fp - F)))
        out = pl.pallas_call(
            _fused_bias_kernel,
            out_shape=jax.ShapeDtypeStruct((B, Op), out_dtype),
        )(xc, wt, b)
        return out if Op == out_dim else out[:, :out_dim]

    # ------------------ tiled, pipelined path ------------------------------
    tm = max(8, (tm // 8) * 8)
    tn = max(128, (tn // 128) * 128)
    tk_max = max(128, (tk_max // 128) * 128)

    # M tiles: balanced so x is padded by < 8 rows; TM a multiple of 8.
    B8 = _round_up(B, 8)
    nm = _cdiv(B8, tm)
    TM = _round_up(_cdiv(B8, nm), 8)
    Bp = TM * nm

    # N tiles: TN must divide Op (weight was padded once at prepare time).
    TN = min(tn, Op)
    while Op % TN != 0:
        TN -= 128
    nn_ = Op // TN

    # v7x has 2 TensorCores: make sure the parallel axes expose >= 2 blocks.
    if nm * nn_ == 1 and Op % 256 == 0:
        TN = Op // 2
        nn_ = 2

    # K tiles: collapse the K grid axis whenever the padded K fits the tile
    # budget -> no accumulator RMW, no init/finalize, no per-K step overhead.
    if Fp <= tk_max:
        TK, nk = Fp, 1
    else:
        TK = tk_max
        while Fp % TK != 0:
            TK -= 128
        nk = Fp // TK

    # Per-call x cast/pad only when actually needed (F is usually a multiple
    # of 128 at model level, and Bp - B < 8 by construction).
    xc = x.astype(cdt)
    if Bp != B or Fp != F:
        xc = jnp.pad(xc, ((0, Bp - B), (0, Fp - F)))

    # Right-size the VMEM budget from the actual double-buffered tile bytes
    # (don't ship a 48 MiB ceiling on v7x's 64 MiB part).
    tile_bytes = 2 * (TM * TK * cbytes + TK * TN * cbytes + TN * 4
                      + TM * TN * obytes)
    if nk > 1:
        tile_bytes += TM * TN * 4  # f32 accumulator scratch
    vmem_limit = int(min(max(2 * tile_bytes, 24 << 20), 96 << 20))

    if nk == 1:
        out = pl.pallas_call(
            _fused_bias_kernel,
            out_shape=jax.ShapeDtypeStruct((Bp, Op), out_dtype),
            grid_spec=pltpu.PrefetchScalarGridSpec(
                num_scalar_prefetch=0,
                grid=(nm, nn_),
                in_specs=[
                    pl.BlockSpec((TM, TK), lambda i, j: (i, 0)),   # x tile
                    pl.BlockSpec((TK, TN), lambda i, j: (0, j)),   # W.T tile
                    pl.BlockSpec((1, TN), lambda i, j: (0, j)),    # bias tile
                ],
                out_specs=pl.BlockSpec((TM, TN), lambda i, j: (i, j)),
            ),
            compiler_params=pltpu.CompilerParams(
                dimension_semantics=("parallel", "parallel"),
                vmem_limit_bytes=vmem_limit,
            ),
        )(xc, wt, b)
    else:
        out = pl.pallas_call(
            _acc_bias_kernel,
            out_shape=jax.ShapeDtypeStruct((Bp, Op), out_dtype),
            grid_spec=pltpu.PrefetchScalarGridSpec(
                num_scalar_prefetch=0,
                grid=(nm, nn_, nk),
                in_specs=[
                    pl.BlockSpec((TM, TK), lambda i, j, k: (i, k)),
                    pl.BlockSpec((TK, TN), lambda i, j, k: (k, j)),
                    pl.BlockSpec((1, TN), lambda i, j, k: (0, j)),
                ],
                out_specs=pl.BlockSpec((TM, TN), lambda i, j, k: (i, j)),
                scratch_shapes=[pltpu.VMEM((TM, TN), jnp.float32)],
            ),
            compiler_params=pltpu.CompilerParams(
                dimension_semantics=("parallel", "parallel", "arbitrary"),
                vmem_limit_bytes=vmem_limit,
            ),
        )(xc, wt, b)

    if Bp != B or Op != out_dim:
        out = out[:B, :out_dim]
    return out


def dec_linear_forward(x, params, *, tm=512, tn=512, tk_max=2048):
    """y = x @ W.T + b with W pre-transposed/padded by prepare_dec_linear_params."""
    F = params["in_dim"]
    O = params["out_dim"]
    assert x.shape[-1] == F, f"expected last dim {F}, got {x.shape}"
    lead = x.shape[:-1]
    x2d = x if x.ndim == 2 else x.reshape((-1, F))
    y = _dec_linear_fwd(x2d, params["weight_t"], params["bias"],
                        out_dim=O, tm=tm, tn=tn, tk_max=tk_max)
    return y if x.ndim == 2 else y.reshape(lead + (O,))


def init_dec_linear_params(key, feature_dimension, img_width, img_height,
                           dtype=jnp.float32):
    """nn.Linear-shaped params: xavier-normal-ish weight (O,F), uniform bias (O,)."""
    out_dim = img_width * img_height
    k_w, k_b = jax.random.split(key)
    std = (2.0 / (feature_dimension + out_dim)) ** 0.5
    weight = std * jax.random.normal(k_w, (out_dim, feature_dimension), dtype)
    bound = 1.0 / (feature_dimension ** 0.5)
    bias = jax.random.uniform(k_b, (out_dim,), dtype, -bound, bound)
    return weight, bias


if __name__ == "__main__":
    # Module-consistent small shapes:
    # feature_dimension=32, img_width=8, img_height=8 -> out_dim = 64.
    batch = 8
    feature_dimension = 32
    img_width, img_height = 8, 8
    out_dim = img_width * img_height

    key = jax.random.PRNGKey(0)
    k_x, k_p, k_x2, k_p2 = jax.random.split(key, 4)

    x = jax.random.normal(k_x, (batch, feature_dimension), jnp.float32)
    weight, bias = init_dec_linear_params(k_p, feature_dimension,
                                          img_width, img_height)
    y_ref = x @ weight.T + bias

    # Default: bf16 weight/x stream, f32 accumulate (small fast path).
    params_bf16 = prepare_dec_linear_params(weight, bias)
    y = jax.block_until_ready(dec_linear_forward(x, params_bf16))
    assert y.shape == (batch, out_dim)
    assert jnp.allclose(y, y_ref, atol=5e-2, rtol=5e-2), "bf16 small path mismatch"

    # f32 compute path: tight check of the kernel semantics.
    params_f32 = prepare_dec_linear_params(weight, bias,
                                           compute_dtype=jnp.float32)
    y32 = jax.block_until_ready(dec_linear_forward(x, params_f32))
    assert jnp.allclose(y32, y_ref, atol=1e-5, rtol=1e-5), "f32 small path mismatch"

    # Also exercise the tiled/pipelined path at a medium shape (bf16 default).
    B2, F2, W2, H2 = 256, 512, 32, 32            # out_dim = 1024
    x2 = jax.random.normal(k_x2, (B2, F2), jnp.float32)
    w2, b2 = init_dec_linear_params(k_p2, F2, W2, H2)
    p2 = prepare_dec_linear_params(w2, b2)
    y2 = jax.block_until_ready(dec_linear_forward(x2, p2))
    y2_ref = (jnp.dot(x2.astype(jnp.bfloat16), w2.T.astype(jnp.bfloat16),
                      preferred_element_type=jnp.float32) + b2)
    assert y2.shape == (B2, W2 * H2)
    assert jnp.allclose(y2, y2_ref, atol=5e-3, rtol=5e-3), "tiled path mismatch"

    print("KERNEL_OK")
</pallas_src>

<mosaic_0001>
module attributes {stable_mosaic.version = 11 : i64} {
  func.func @_fused_bias_kernel(%arg0: memref<8x128xbf16, #tpu.memory_space<vmem>>, %arg1: memref<128x128xbf16, #tpu.memory_space<vmem>>, %arg2: memref<1x128xf32, #tpu.memory_space<vmem>>, %arg3: memref<8x128xf32, #tpu.memory_space<vmem>>) attributes {dimension_semantics = [], scalar_prefetch = 0 : i64, scratch_operands = 0 : i64, tpu.core_type = #tpu.core_type<tc>} {
    %c0 = arith.constant 0 : index
    %c0_0 = arith.constant 0 : index
    %0 = vector.load %arg0[%c0, %c0_0] : memref<8x128xbf16, #tpu.memory_space<vmem>>, vector<8x128xbf16>
    %c0_1 = arith.constant 0 : index
    %c0_2 = arith.constant 0 : index
    %1 = vector.load %arg1[%c0_1, %c0_2] : memref<128x128xbf16, #tpu.memory_space<vmem>>, vector<128x128xbf16>
    %cst = arith.constant dense<0.000000e+00> : vector<8x128xf32>
    %2 = tpu.matmul %0, %1, %cst {dimension_numbers = #tpu.dot_dimension_numbers<[1], [0], [0], [1], [0, 0, 1, 1], [], []>} : vector<8x128xbf16>, vector<128x128xbf16>, vector<8x128xf32> -> vector<8x128xf32>
    %c0_3 = arith.constant 0 : index
    %c0_4 = arith.constant 0 : index
    %3 = vector.load %arg2[%c0_3, %c0_4] : memref<1x128xf32, #tpu.memory_space<vmem>>, vector<1x128xf32>
    %4 = vector.broadcast %3 : vector<1x128xf32> to vector<8x128xf32>
    %5 = arith.addf %2, %4 : vector<8x128xf32>
    %c0_5 = arith.constant 0 : index
    %c0_6 = arith.constant 0 : index
    %6 = vector.load %arg3[%c0_5, %c0_6] : memref<8x128xf32, #tpu.memory_space<vmem>>, vector<8x128xf32>
    tpu.vector_store %arg3[%c0_5, %c0_6], %5 {strides = array<i32>} : memref<8x128xf32, #tpu.memory_space<vmem>>, vector<8x128xf32>,
    return
  }
}

</mosaic_0001>

<bundles_post_ra>
// kernel: _dec_linear_fwd.1
= control target key start
LH: loop header
LB: loop body
LE: loop exit
PB: predicated region body
PF: predicated region fallthrough
CT: control target
= control target key end

     0   :  { %8 = vsyncpa [#allocation3], 0  ;;  %s314_s0 = inlined_call_operand.vmem [shape: bf16[8,128], index: 0, kind: input, shape index: {}]   ;;  %s315_s1 = inlined_call_operand.hbm [shape: bf16[128,128], index: 1, kind: input, shape index: {}]   ;;  %s316_s2 = inlined_call_operand.vmem [shape: f32[1,128], index: 2, kind: input, shape index: {}]   ;;  %s317_s3 = inlined_call_operand.hbm [shape: f32[8,128], index: 3, kind: output, shape index: {}]  }
   0x1   :  { %9 = vsyncpa [#allocation4], 0  ;;  %s258_s12 = smov [#allocation2]   ;;  %s210_s16 = scalar_lea.hbm %s315_s1, 1024 }
   0x2   :  { %s17_s13 = sshll.u32 %s258_s12, 4  ;;  %p211_p0 = scmp.ne.s32.totalorder %s315_s1, %s210_s16  ;;  %s18_s13 = int_to_ptr.vmem [resolvable:$true] %s17_s13 }
   0x3   :  { %p214_p1 = scmp.lt.u32.totalorder %s210_s16, %s315_s1 }
   0x5   :  { %p216_p2 = pnand %p214_p1, %p211_p0 }
   0x7   :  { %219 = shalt.err (!%p216_p2)
}
   0x8   :  { %s220_s21 = scalar_lea.vmem %s18_s13, 1024  ;;  %p225_p4 = scmp.lt.s32.totalorder %s18_s13, %s18_s13 }
   0x9   :  { %p221_p3 = scmp.ne.s32.totalorder %s18_s13, %s220_s21  ;;  %p226_p5 = scmp.lt.s32.totalorder %s220_s21, %s220_s21 }
   0xb   :  { %p227_p6 = por %p226_p5, %p225_p4 }
   0xd   :  { %p228_p7 = pnand %p227_p6, %p221_p3 }
   0xf   :  { %231 = shalt.err (!%p228_p7)
}
  0x10   :  { %s259_s22 = smov 64   ;;  %s260_s23 = smov 4  }
  0x11   :  { %23 = dma.hbm_to_vmem [thread:$0]  %s315_s1, 1024, %s18_s13, [#allocation3], %s259_s22, %s259_s22, %s260_s23  }
  0x12   :  { %254 = dma.done.wait [#allocation3], 1024  }
  0x13   :  { %255 = vsyncadd [#allocation3], 4294966272  ;;  %v261_v0 = vmov 0.0   ;;  %vm262_vm0 = vmmov 0   ;;  %v202_v1 = vld [vmem:[#allocation2] sm:$0xff]   ;;  %v203_v2 = vld [vmem:[#allocation2 + $0x8] sm:$0xff]  }
  0x14   :  { %176 = vmatprep.subr.bf16.mxu0 %v261_v0  ;;  %192 = vmatprep.mubr.msk.bf16.mxu0 %vm262_vm0, %v261_v0  ;;  %v204_v3 = vld [vmem:[#allocation2 + $0x10] sm:$0xff]   ;;  %v205_v4 = vld [vmem:[#allocation2 + $0x18] sm:$0xff]   ;;  %v206_v5 = vld [vmem:[#allocation2 + $0x20] sm:$0xff]   ;;  %s263_s29 = smov [#allocation5]  }
  0x15   :  { %177 = vmatpush3.bf16.msra.mxu0 %v202_v1  ;;  %v207_v6 = vld [vmem:[#allocation2 + $0x28] sm:$0xff]   ;;  %v208_v7 = vld [vmem:[#allocation2 + $0x30] sm:$0xff]   ;;  %v209_v8 = vld [vmem:[#allocation2 + $0x38] sm:$0xff]   ;;  %s149_s30 = sshll.u32 %s263_s29, 4  ;;  %s150_s30 = int_to_ptr.vmem [resolvable:$true] %s149_s30 }
  0x16   :  { %178 = vmatprep.subr.bf16.mxu0 %v261_v0  ;;  %v30_v9 = vld [vmem:[%s314_s0] sm:$0xf]  ;;  %s232_s4 = scalar_lea.vmem %s150_s30, 128  ;;  %p237_p9 = scmp.lt.s32.totalorder %s150_s30, %s150_s30 }
  0x17   :  { %v158_v10 = vld [vmem:[%s316_s2] ss:$0 sm:$0xff]  ;;  %p233_p8 = scmp.ne.s32.totalorder %s150_s30, %s232_s4  ;;  %p238_p10 = scmp.lt.s32.totalorder %s232_s4, %s232_s4 }
  0x19   :  { %179 = vmatpush3.bf16.msra.mxu0 %v203_v2  ;;  %p239_p11 = por %p238_p10, %p237_p9 }
  0x1a   :  { %180 = vmatprep.subr.bf16.mxu0 %v261_v0 }
  0x1b   :  { %p240_p12 = pnand %p239_p11, %p233_p8 }
  0x1d   :  { %181 = vmatpush3.bf16.msra.mxu0 %v204_v3 }
  0x1e   :  { %182 = vmatprep.subr.bf16.mxu0 %v261_v0 }
  0x21   :  { %183 = vmatpush3.bf16.msra.mxu0 %v205_v4 }
  0x22   :  { %184 = vmatprep.subr.bf16.mxu0 %v261_v0 }
  0x25   :  { %185 = vmatpush3.bf16.msra.mxu0 %v206_v5 }
  0x26   :  { %186 = vmatprep.subr.bf16.mxu0 %v261_v0 }
  0x29   :  { %187 = vmatpush3.bf16.msra.mxu0 %v207_v6 }
  0x2a   :  { %188 = vmatprep.subr.bf16.mxu0 %v261_v0 }
  0x2d   :  { %189 = vmatpush3.bf16.msra.mxu0 %v208_v7 }
  0x2e   :  { %190 = vmatprep.subr.bf16.mxu0 %v261_v0 }
  0x31   :  { %191 = vmatpush3.bf16.msra.mxu0 %v209_v8 }
  0x34   :  { %193 = vmatmul.mubr.bf16.vlgmr.msra.gmra.mrb[0].mxu0 %v30_v9 }
 0x107   :  { %v136_v11 = vpop.f32.mrb[0].mxu0 }
 0x108   :  { %v137_v12 = vadd.f32 %v158_v10, %v136_v11  ;;  %v194_v13 = vpop.f32.mrb[1].mxu0 }
 0x109   :  { %v139_v14 = vpop.f32.mrb[2].mxu0 }
 0x10a   :  { %142 = vst [vmem:[#allocation5] sm:$0xff] %v137_v12  ;;  %v195_v15 = vpop.f32.mrb[3].mxu0 }
 0x10b   :  { %243 = shalt.err (!%p240_p12)
}
 0x10c   :  { %s244_s2 = scalar_lea.hbm %s317_s3, 128 }
 0x10d   :  { %p245_p13 = scmp.ne.s32.totalorder %s317_s3, %s244_s2  ;;  %p248_p0 = scmp.lt.u32.totalorder %s244_s2, %s317_s3 }
 0x10f   :  { %p250_p1 = pnand %p248_p0, %p245_p13 }
 0x111   :  { %253 = shalt.err (!%p250_p1)
}
 0x112   :  { %152 = dma.vmem_to_hbm [thread:$0]  %s150_s30, 128, %s317_s3, [#allocation4]  }
 0x113   :  { %256 = dma.done.wait [#allocation4], 128  }
 0x114   :  { %257 = vsyncadd [#allocation4], 4294967168 }
 0x115   :  { %156 = vsyncpa [#allocation3], 1 }
 0x116   :  { %157 = vsyncpa [#allocation4], 1 }

</bundles_post_ra>
